<compile_context>
chip_gen: v6e
topology: v6e:2x2x1
jax: 0.10.0
libtpu: 0.0.40
codegen_flags: <defaults>
</compile_context>

<pallas_src>
import math

import jax
import jax.numpy as jnp
from jax.experimental import pallas as pl
from jax.experimental.pallas import tpu as pltpu


# -----------------------------------------------------------------------------
# Tiling helpers
# -----------------------------------------------------------------------------
def _pick_tile(n, target, unit=8):
    """Largest multiple of `unit` <= min(target, n) that divides n (else n)."""
    t = min(target, n)
    t = max(unit, (t // unit) * unit)
    while t > unit and n % t != 0:
        t -= unit
    if n % t != 0:
        t = n
    return t


# -----------------------------------------------------------------------------
# Stage 1: xw = x @ w   (row-tiled, f32 compute, bf16 output)
# -----------------------------------------------------------------------------
def xw_kernel(x_ref, w_ref, o_ref):
    o_ref[...] = jnp.dot(
        x_ref[...], w_ref[...], preferred_element_type=jnp.float32
    ).astype(o_ref.dtype)


def compute_xw(x, w, *, out_dtype=jnp.bfloat16, tm_target=512):
    N, in_dim = x.shape
    out_dim = w.shape[1]
    tm = _pick_tile(N, tm_target)

    cost = pl.CostEstimate(
        flops=2 * N * in_dim * out_dim,
        transcendentals=0,
        bytes_accessed=N * in_dim * 4 + in_dim * out_dim * 4 + N * out_dim * 2,
    )
    return pl.pallas_call(
        xw_kernel,
        out_shape=jax.ShapeDtypeStruct((N, out_dim), out_dtype),
        grid=(N // tm,),
        in_specs=[
            pl.BlockSpec((tm, in_dim), lambda i: (i, 0)),
            pl.BlockSpec((in_dim, out_dim), lambda i: (0, 0)),
        ],
        out_specs=pl.BlockSpec((tm, out_dim), lambda i: (i, 0)),
        compiler_params=pltpu.CompilerParams(
            dimension_semantics=("parallel",),
            vmem_limit_bytes=32 * 1024 * 1024,
        ),
        cost_estimate=cost,
    )(x, w)


# -----------------------------------------------------------------------------
# Stage 2: out = adj @ xw + b   (tiled reduction with f32 VMEM accumulator)
# -----------------------------------------------------------------------------
def gcn_agg_kernel(adj_ref, xw_ref, b_ref, o_ref, acc_ref):
    k = pl.program_id(1)

    @pl.when(k == 0)
    def _init():
        acc_ref[...] = jnp.zeros_like(acc_ref)

    # bf16 inputs on the MXU, f32 accumulation.
    acc_ref[...] += jnp.dot(
        adj_ref[...], xw_ref[...], preferred_element_type=jnp.float32
    )

    @pl.when(k == pl.num_programs(1) - 1)
    def _finalize():
        o_ref[...] = (acc_ref[...] + b_ref[...]).astype(o_ref.dtype)


def aggregate(adj, xw, b, *, tm_target=256, tk_target=512):
    N = adj.shape[0]
    out_dim = xw.shape[1]
    tm = _pick_tile(N, tm_target)
    tk = _pick_tile(N, tk_target)
    b2 = b.reshape(1, out_dim).astype(jnp.float32)

    adj_bytes = adj.dtype.itemsize
    xw_bytes = xw.dtype.itemsize
    cost = pl.CostEstimate(
        flops=2 * N * N * out_dim,
        transcendentals=0,
        bytes_accessed=(
            N * N * adj_bytes                      # adj streamed once
            + (N // tm) * N * out_dim * xw_bytes   # xw re-read per row tile
            + N * out_dim * 4                      # output
            + out_dim * 4                          # bias
        ),
    )

    return pl.pallas_call(
        gcn_agg_kernel,
        out_shape=jax.ShapeDtypeStruct((N, out_dim), jnp.float32),
        grid=(N // tm, N // tk),
        in_specs=[
            pl.BlockSpec((tm, tk), lambda i, k: (i, k)),          # adj tile
            pl.BlockSpec((tk, out_dim), lambda i, k: (k, 0)),     # xw tile
            pl.BlockSpec((1, out_dim), lambda i, k: (0, 0)),      # bias
        ],
        out_specs=pl.BlockSpec((tm, out_dim), lambda i, k: (i, 0)),
        scratch_shapes=[pltpu.VMEM((tm, out_dim), jnp.float32)],
        compiler_params=pltpu.CompilerParams(
            # Row tiles are independent -> shard across TCs on v7x;
            # k is the reduction over nodes -> must stay 'arbitrary'.
            dimension_semantics=("parallel", "arbitrary"),
            vmem_limit_bytes=32 * 1024 * 1024,
        ),
        cost_estimate=cost,
    )(adj, xw, b2)


# -----------------------------------------------------------------------------
# Full GCNConv forward
# -----------------------------------------------------------------------------
def gcn_conv(x, adj, w, b):
    """x: [N, in_dim] f32, adj: [N, N] f32, w: [in_dim, out_dim] f32, b: [out_dim]."""
    # dropout: identity in eval mode.
    xw = compute_xw(x, w, out_dtype=jnp.bfloat16)          # [N, out_dim] bf16
    adj_bf16 = adj.astype(jnp.bfloat16)                    # halve adj HBM traffic
    return aggregate(adj_bf16, xw, b)                      # [N, out_dim] f32


def xavier_uniform(key, shape):
    fan_in, fan_out = shape
    bound = math.sqrt(6.0 / (fan_in + fan_out))
    return jax.random.uniform(key, shape, jnp.float32, minval=-bound, maxval=bound)


if __name__ == "__main__":
    # Small shapes: N=128 nodes, in_dim=64, out_dim=128.
    N, in_dim, out_dim = 128, 64, 128

    key = jax.random.PRNGKey(0)
    kx, kadj, kw, kc = jax.random.split(key, 4)

    x = jax.random.normal(kx, (N, in_dim), dtype=jnp.float32)

    # Symmetric, row-normalized dense adjacency (GCN-style).
    a = (jax.random.uniform(kadj, (N, N)) < 0.1).astype(jnp.float32)
    a = jnp.maximum(a, a.T) + jnp.eye(N, dtype=jnp.float32)
    adj = a / jnp.sum(a, axis=1, keepdims=True)

    # Deterministic parameter init matching nn.Module __init__ shapes.
    w = xavier_uniform(kw, (in_dim, out_dim))          # self.w
    convert = xavier_uniform(kc, (in_dim, out_dim))    # self.convert (unused in forward)
    b = jnp.zeros((out_dim,), dtype=jnp.float32)       # self.b (zeros_ init)

    out = gcn_conv(x, adj, w, b)
    out = jax.block_until_ready(out)

    # Pure-JAX f32 reference; relaxed tolerance because adj/xw feed the MXU
    # in bf16 (f32 accumulation).
    ref = adj @ (x @ w) + b[None, :]
    assert out.shape == (N, out_dim)
    assert jnp.allclose(out, ref, atol=5e-2, rtol=5e-2), (
        float(jnp.max(jnp.abs(out - ref)))
    )

    print("KERNEL_OK")
</pallas_src>

<mosaic_0001>
module attributes {stable_mosaic.version = 11 : i64} {
  func.func @xw_kernel(%arg0: i32, %arg1: memref<128x64xf32, #tpu.memory_space<vmem>>, %arg2: memref<64x128xf32, #tpu.memory_space<vmem>>, %arg3: memref<128x128xbf16, #tpu.memory_space<vmem>>) attributes {dimension_semantics = [#tpu.dimension_semantics<parallel>], iteration_bounds = array<i64: 1>, scalar_prefetch = 0 : i64, scratch_operands = 0 : i64, tpu.core_type = #tpu.core_type<tc>, window_params = [{transform_indices = @transform_0, window_bounds = array<i64: 128, 64>}, {pipeline_mode = #tpu.pipeline_mode<synchronous>, transform_indices = @transform_1, window_bounds = array<i64: 64, 128>}, {transform_indices = @transform_2, window_bounds = array<i64: 128, 128>}]} {
    %c0 = arith.constant 0 : index
    %c0_0 = arith.constant 0 : index
    %0 = vector.load %arg1[%c0, %c0_0] : memref<128x64xf32, #tpu.memory_space<vmem>>, vector<128x64xf32>
    %c0_1 = arith.constant 0 : index
    %c0_2 = arith.constant 0 : index
    %1 = vector.load %arg2[%c0_1, %c0_2] : memref<64x128xf32, #tpu.memory_space<vmem>>, vector<64x128xf32>
    %cst = arith.constant dense<0.000000e+00> : vector<128x128xf32>
    %2 = tpu.matmul %0, %1, %cst {dimension_numbers = #tpu.dot_dimension_numbers<[1], [0], [0], [1], [0, 0, 1, 1], [], []>} : vector<128x64xf32>, vector<64x128xf32>, vector<128x128xf32> -> vector<128x128xf32>
    %3 = arith.truncf %2 : vector<128x128xf32> to vector<128x128xbf16>
    %c0_3 = arith.constant 0 : index
    %c0_4 = arith.constant 0 : index
    %4 = vector.load %arg3[%c0_3, %c0_4] : memref<128x128xbf16, #tpu.memory_space<vmem>>, vector<128x128xbf16>
    tpu.vector_store %arg3[%c0_3, %c0_4], %3 {strides = array<i32>} : memref<128x128xbf16, #tpu.memory_space<vmem>>, vector<128x128xbf16>,
    return
  }
  func.func @transform_0(%arg0: i32) -> (i32, i32) {
    %c0_i32 = arith.constant 0 : i32
    %c0_i32_0 = arith.constant 0 : i32
    return %arg0, %c0_i32 : i32, i32
  }
  func.func @transform_1(%arg0: i32) -> (i32, i32) {
    %c0_i32 = arith.constant 0 : i32
    %c0_i32_0 = arith.constant 0 : i32
    %c0_i32_1 = arith.constant 0 : i32
    return %c0_i32, %c0_i32_0 : i32, i32
  }
  func.func @transform_2(%arg0: i32) -> (i32, i32) {
    %c0_i32 = arith.constant 0 : i32
    %c0_i32_0 = arith.constant 0 : i32
    return %arg0, %c0_i32 : i32, i32
  }
}

</mosaic_0001>

<bundles_post_ra>
// kernel: tpu_custom_call.1
= control target key start
LH: loop header
LB: loop body
LE: loop exit
PB: predicated region body
PF: predicated region fallthrough
CT: control target
= control target key end

     0   :  { %s635_s0 = inlined_call_operand.vmem [shape: f32[128,64], index: 0, kind: input, shape index: {}]   ;;  %s636_s1 = inlined_call_operand.vmem [shape: f32[64,128], index: 1, kind: input, shape index: {}]   ;;  %s637_s2 = inlined_call_operand.hbm [shape: bf16[128,128], index: 2, kind: output, shape index: {}]  }
   0x1   :  { %v35_v0 = vld [vmem:[%s636_s1 + $0x38] sm:$0xff]  ;;  %v34_v1 = vld [vmem:[%s636_s1 + $0x30] sm:$0xff]  ;;  %v33_v2 = vld [vmem:[%s636_s1 + $0x28] sm:$0xff] }
   0x2   :  { %445 = vmatprep.subr.mxu0 %v35_v0  ;;  %485 = vmatprep.subr.mxu1 %v35_v0  ;;  %v32_v3 = vld [vmem:[%s636_s1 + $0x20] sm:$0xff]  ;;  %v31_v4 = vld [vmem:[%s636_s1 + $0x18] sm:$0xff]  ;;  %v30_v5 = vld [vmem:[%s636_s1 + $0x10] sm:$0xff] }
   0x3   :  { %446 = vmatpush3.msra.mxu0 %v35_v0  ;;  %493 = vmatpush3.msra.mxu1 %v35_v0 }
   0x4   :  { %447 = vmatprep.subr.mxu0 %v34_v1  ;;  %486 = vmatprep.subr.mxu1 %v34_v1 }
   0x5   :  { %448 = vmatpush3.msra.mxu0 %v34_v1  ;;  %494 = vmatpush3.msra.mxu1 %v34_v1 }
   0x6   :  { %449 = vmatprep.subr.mxu0 %v33_v2  ;;  %487 = vmatprep.subr.mxu1 %v33_v2 }
   0x7   :  { %450 = vmatpush3.msra.mxu0 %v33_v2  ;;  %495 = vmatpush3.msra.mxu1 %v33_v2 }
   0x8   :  { %451 = vmatprep.subr.mxu0 %v32_v3  ;;  %488 = vmatprep.subr.mxu1 %v32_v3 }
   0x9   :  { %452 = vmatpush3.msra.mxu0 %v32_v3  ;;  %496 = vmatpush3.msra.mxu1 %v32_v3 }
   0xa   :  { %7 = vsyncpa [#allocation3], 0  ;;  %453 = vmatprep.subr.mxu0 %v31_v4  ;;  %489 = vmatprep.subr.mxu1 %v31_v4  ;;  %v29_v6 = vld [vmem:[%s636_s1 + $0x8] sm:$0xff]  ;;  %v28_v7 = vld [vmem:[%s636_s1] sm:$0xff]  ;;  %vm36_vm0 = vcmask 523264  }
   0xb   :  { %454 = vmatpush3.msra.mxu0 %v31_v4  ;;  %497 = vmatpush3.msra.mxu1 %v31_v4  ;;  %v12_v8 = vld [vmem:[%s635_s0] sm:$0xff]  ;;  %v13_v10 = vld [vmem:[%s635_s0 + $0x8] sm:$0xff]  ;;  %v14_v12 = vld [vmem:[%s635_s0 + $0x10] sm:$0xff] }
   0xc   :  { %455 = vmatprep.subr.mxu0 %v30_v5  ;;  %490 = vmatprep.subr.mxu1 %v30_v5  ;;  %v20_v9 = vld [vmem:[%s635_s0 + $0x40] sm:$0xff]  ;;  %v21_v11 = vld [vmem:[%s635_s0 + $0x48] sm:$0xff]  ;;  %v22_v13 = vld [vmem:[%s635_s0 + $0x50] sm:$0xff] }
   0xd   :  { %456 = vmatpush3.msra.mxu0 %v30_v5  ;;  %498 = vmatpush3.msra.mxu1 %v30_v5  ;;  %v15_v14 = vld [vmem:[%s635_s0 + $0x18] sm:$0xff]  ;;  %v16_v16 = vld [vmem:[%s635_s0 + $0x20] sm:$0xff]  ;;  %v17_v18 = vld [vmem:[%s635_s0 + $0x28] sm:$0xff] }
   0xe   :  { %457 = vmatprep.subr.mxu0 %v29_v6  ;;  %491 = vmatprep.subr.mxu1 %v29_v6  ;;  %v23_v15 = vld [vmem:[%s635_s0 + $0x58] sm:$0xff]  ;;  %v24_v17 = vld [vmem:[%s635_s0 + $0x60] sm:$0xff]  ;;  %v25_v19 = vld [vmem:[%s635_s0 + $0x68] sm:$0xff] }
   0xf   :  { %458 = vmatpush3.msra.mxu0 %v29_v6  ;;  %499 = vmatpush3.msra.mxu1 %v29_v6  ;;  %v18_v20 = vld [vmem:[%s635_s0 + $0x30] sm:$0xff]  ;;  %v19_v22 = vld [vmem:[%s635_s0 + $0x38] sm:$0xff] }
  0x10   :  { %459 = vmatprep.subr.mxu0 %v28_v7  ;;  %492 = vmatprep.subr.mxu1 %v28_v7  ;;  %v26_v21 = vld [vmem:[%s635_s0 + $0x70] sm:$0xff]  ;;  %v27_v23 = vld [vmem:[%s635_s0 + $0x78] sm:$0xff]  ;;  %s526_s0 = smov [#allocation2]  }
  0x11   :  { %460 = vmatpush3.msra.mxu0 %v28_v7  ;;  %500 = vmatpush3.msra.mxu1 %v28_v7  ;;  %s315_s28 = sshll.u32 %s526_s0, 4  ;;  %s316_s28 = int_to_ptr.vmem [resolvable:$true] %s315_s28 }
  0x12   :  { %461 = vmatprep.mubr.msk.f32.mxu0 %vm36_vm0, %v12_v8  ;;  %473 = vmatprep.mubr.msk.f32.mxu1 %vm36_vm0, %v20_v9  ;;  %s504_s29 = scalar_lea.vmem %s316_s28, 1024  ;;  %p509_p1 = scmp.lt.s32.totalorder %s316_s28, %s316_s28 }
  0x13   :  { %462 = vmatmul.mubr.msk.f32.vlgmr.msra.gmra.mxu0 %vm36_vm0, %v13_v10  ;;  %474 = vmatmul.mubr.msk.f32.vlgmr.msra.gmra.mxu1 %vm36_vm0, %v21_v11  ;;  %p505_p0 = scmp.ne.s32.totalorder %s316_s28, %s504_s29  ;;  %p510_p2 = scmp.lt.s32.totalorder %s504_s29, %s504_s29 }
  0x14   :  { %464 = vmatprep.mubr.msk.f32.mxu0 %vm36_vm0, %v14_v12  ;;  %476 = vmatprep.mubr.msk.f32.mxu1 %vm36_vm0, %v22_v13 }
  0x15   :  { %p511_p3 = por %p510_p2, %p509_p1 }
  0x17   :  { %465 = vmatmul.mubr.msk.f32.gmra.mxu0 %vm36_vm0, %v15_v14  ;;  %477 = vmatmul.mubr.msk.f32.gmra.mxu1 %vm36_vm0, %v23_v15  ;;  %p512_p4 = pnand %p511_p3, %p505_p0 }
  0x18   :  { %467 = vmatprep.mubr.msk.f32.mxu0 %vm36_vm0, %v16_v16  ;;  %479 = vmatprep.mubr.msk.f32.mxu1 %vm36_vm0, %v24_v17 }
  0x1b   :  { %468 = vmatmul.mubr.msk.f32.gmra.mxu0 %vm36_vm0, %v17_v18  ;;  %480 = vmatmul.mubr.msk.f32.gmra.mxu1 %vm36_vm0, %v25_v19 }
  0x1c   :  { %470 = vmatprep.mubr.msk.f32.mxu0 %vm36_vm0, %v18_v20  ;;  %482 = vmatprep.mubr.msk.f32.mxu1 %vm36_vm0, %v26_v21 }
  0x1f   :  { %471 = vmatmul.mubr.msk.f32.gmra.mxu0 %vm36_vm0, %v19_v22  ;;  %483 = vmatmul.mubr.msk.f32.gmra.mxu1 %vm36_vm0, %v27_v23 }
  0xd3   :  { %v463_v24 = vpop.f32.mrf.mxu0  ;;  %v475_v25 = vpop.f32.mrf.mxu1 }
  0xd5   :  { %v151_v26 = vpop.f32.mrf.mxu0  ;;  %v191_v27 = vpop.f32.mrf.mxu1 }
  0xd6   :  { %v377_v28 = vpack.c.bf16 %v463_v24, %v151_v26  ;;  %v397_v29 = vpack.c.bf16 %v475_v25, %v191_v27 }
  0xd7   :  { %v466_v30 = vpop.f32.mrf.mxu0  ;;  %v478_v31 = vpop.f32.mrf.mxu1 }
  0xd8   :  { %378 = vst [vmem:[#allocation2] sm:$0xff] %v377_v28   ;;  %417 = vst [vmem:[#allocation2 + $0x20] sm:$0xff] %v397_v29  }
  0xd9   :  { %v161_v32 = vpop.f32.mrf.mxu0  ;;  %v201_v33 = vpop.f32.mrf.mxu1 }
  0xda   :  { %v382_v34 = vpack.c.bf16 %v466_v30, %v161_v32  ;;  %v402_v35 = vpack.c.bf16 %v478_v31, %v201_v33 }
  0xdb   :  { %v469_v36 = vpop.f32.mrf.mxu0  ;;  %v481_v37 = vpop.f32.mrf.mxu1 }
  0xdc   :  { %414 = vst [vmem:[#allocation2 + $0x8] sm:$0xff] %v382_v34   ;;  %418 = vst [vmem:[#allocation2 + $0x28] sm:$0xff] %v402_v35  }
  0xdd   :  { %v171_v38 = vpop.f32.mrf.mxu0  ;;  %v211_v39 = vpop.f32.mrf.mxu1 }
  0xde   :  { %v387_v40 = vpack.c.bf16 %v469_v36, %v171_v38  ;;  %v407_v41 = vpack.c.bf16 %v481_v37, %v211_v39 }
  0xdf   :  { %v472_v42 = vpop.f32.mrf.mxu0  ;;  %v484_v43 = vpop.f32.mrf.mxu1 }
  0xe0   :  { %415 = vst [vmem:[#allocation2 + $0x10] sm:$0xff] %v387_v40   ;;  %419 = vst [vmem:[#allocation2 + $0x30] sm:$0xff] %v407_v41  }
  0xe1   :  { %v181_v44 = vpop.f32.mrf.mxu0  ;;  %v221_v45 = vpop.f32.mrf.mxu1 }
  0xe2   :  { %v392_v46 = vpack.c.bf16 %v472_v42, %v181_v44  ;;  %v412_v47 = vpack.c.bf16 %v484_v43, %v221_v45 }
  0xe4   :  { %416 = vst [vmem:[#allocation2 + $0x18] sm:$0xff] %v392_v46   ;;  %420 = vst [vmem:[#allocation2 + $0x38] sm:$0xff] %v412_v47  }
  0xe5   :  { %515 = shalt.err (!%p512_p4)
}
  0xe6   :  { %s527_s30 = smov 64   ;;  %s528_s1 = smov 4  }
  0xe7   :  { %321 = dma.vmem_to_hbm [thread:$0]  %s316_s28, 1024, %s637_s2, [#allocation3], %s527_s30, %s527_s30, %s528_s1  }
  0xe8   :  { %524 = dma.done.wait [#allocation3], 1024  }
  0xe9   :  { %525 = vsyncadd [#allocation3], 4294966272 }
  0xea   :  { %325 = vsyncpa [#allocation3], 1 }

</bundles_post_ra>
